<compile_context>
chip_gen: v7x
topology: tpu7x:2x2x1
jax: 0.10.0
libtpu: 0.0.40
codegen_flags: <defaults>
</compile_context>

<pallas_src>
import jax
import jax.numpy as jnp
from jax.experimental import pallas as pl
from jax.experimental.pallas import tpu as pltpu


def _maxpool2x2_kernel(x_ref, o_ref):
    # x_ref: (TH, 2, Wo, 2*C) -- TH pooling row-pairs; axis 1 holds the two
    #                            input rows of each window; the last dim packs
    #                            the two W-neighbors' channel vectors on lanes.
    # o_ref: (TH, Wo, C)
    c = o_ref.shape[-1]
    # H-pool: contiguous VPU max of the two row slabs.
    rows = jnp.maximum(x_ref[:, 0, :, :], x_ref[:, 1, :, :])        # (TH, Wo, 2C)
    # W-pool: max of the two lane-contiguous halves of the 2C lane dim.
    o_ref[...] = jnp.maximum(rows[..., :c], rows[..., c:])          # (TH, Wo, C)


def _pick_row_tile(rows, row_pair_bytes, target_bytes=2 * 1024 * 1024):
    """Largest divisor of `rows` whose input tile (th row-pairs) is <= target."""
    best = 1
    for th in range(1, rows + 1):
        if rows % th == 0 and th * row_pair_bytes <= target_bytes:
            best = th
    return best


def maxpool2x2_nhwc(x):
    """2x2 / stride-2 max pool on an NHWC tensor (transpose-free entry point)."""
    n, h, w, c = x.shape
    ho, wo = h // 2, w // 2
    assert ho >= 1 and wo >= 1, "spatial dims must be >= 2"
    # PyTorch MaxPool2d(2) floors odd spatial dims (drops last row/col).
    if h != 2 * ho or w != 2 * wo:
        x = x[:, : 2 * ho, : 2 * wo, :]

    # Zero-cost row-major view: (N, H, W, C) -> (N*Ho, 2, Wo, 2*C).
    # Folding N into the row axis gives one long parallel grid dimension.
    r = n * ho
    xv = x.reshape(r, 2, wo, 2 * c)

    row_pair_bytes = 2 * wo * 2 * c * x.dtype.itemsize
    th = _pick_row_tile(r, row_pair_bytes)

    out = pl.pallas_call(
        _maxpool2x2_kernel,
        out_shape=jax.ShapeDtypeStruct((r, wo, c), x.dtype),
        grid=(r // th,),
        in_specs=[
            pl.BlockSpec((th, 2, wo, 2 * c), lambda i: (i, 0, 0, 0)),
        ],
        out_specs=pl.BlockSpec((th, wo, c), lambda i: (i, 0, 0)),
        compiler_params=pltpu.CompilerParams(
            dimension_semantics=("parallel",)),
    )(xv)

    # Zero-cost view back to (N, Ho, Wo, C).
    return out.reshape(n, ho, wo, c)


def downsample(x_nchw):
    """Equivalent of DownSample.forward: nn.MaxPool2d(2) on an NCHW tensor."""
    # TODO(synk): a fully transpose-free NCHW kernel needs an in-kernel lane
    # de-interleave (strided lane compaction via XLU); the NHWC formulation is
    # kept for lowering robustness -- call maxpool2x2_nhwc directly in an
    # NHWC-resident pipeline to avoid the two boundary transposes entirely.
    x_nhwc = jnp.transpose(x_nchw, (0, 2, 3, 1))
    y_nhwc = maxpool2x2_nhwc(x_nhwc)
    return jnp.transpose(y_nhwc, (0, 3, 1, 2))


if __name__ == "__main__":
    key = jax.random.PRNGKey(0)
    x = jax.random.normal(key, (2, 4, 16, 16), dtype=jnp.float32)  # NCHW, like PyTorch

    y = jax.block_until_ready(downsample(x))

    # Pure-JAX reference (same semantics as nn.MaxPool2d(2) on even dims).
    N, C, H, W = x.shape
    ref = jnp.max(x.reshape(N, C, H // 2, 2, W // 2, 2), axis=(3, 5))

    assert y.shape == (N, C, H // 2, W // 2), y.shape
    assert y.dtype == x.dtype
    assert jnp.allclose(y, ref), "kernel output does not match reference max-pool"
    print("KERNEL_OK")
</pallas_src>

<mosaic_0001>
module attributes {stable_mosaic.version = 11 : i64} {
  func.func @_maxpool2x2_kernel(%arg0: i32, %arg1: memref<16x2x8x8xf32, #tpu.memory_space<vmem>>, %arg2: memref<16x8x4xf32, #tpu.memory_space<vmem>>) attributes {dimension_semantics = [#tpu.dimension_semantics<parallel>], iteration_bounds = array<i64: 1>, scalar_prefetch = 0 : i64, scratch_operands = 0 : i64, tpu.core_type = #tpu.core_type<tc>, window_params = [{transform_indices = @transform_0, window_bounds = array<i64: 16, 2, 8, 8>}, {transform_indices = @transform_1, window_bounds = array<i64: 16, 8, 4>}]} {
    %c0 = arith.constant 0 : index
    %c0_0 = arith.constant 0 : index
    %c0_1 = arith.constant 0 : index
    %c0_2 = arith.constant 0 : index
    %0 = vector.load %arg1[%c0, %c0_0, %c0_1, %c0_2] : memref<16x2x8x8xf32, #tpu.memory_space<vmem>>, vector<16x1x8x8xf32>
    %1 = vector.shape_cast %0 : vector<16x1x8x8xf32> to vector<16x8x8xf32>
    %c0_3 = arith.constant 0 : index
    %c1 = arith.constant 1 : index
    %c0_4 = arith.constant 0 : index
    %c0_5 = arith.constant 0 : index
    %2 = vector.load %arg1[%c0_3, %c1, %c0_4, %c0_5] : memref<16x2x8x8xf32, #tpu.memory_space<vmem>>, vector<16x1x8x8xf32>
    %3 = vector.shape_cast %2 : vector<16x1x8x8xf32> to vector<16x8x8xf32>
    %4 = arith.maximumf %1, %3 : vector<16x8x8xf32>
    %5 = vector.extract_strided_slice %4 {offsets = [0, 0, 0], sizes = [16, 8, 4], strides = [1, 1, 1]} : vector<16x8x8xf32> to vector<16x8x4xf32>
    %6 = vector.extract_strided_slice %4 {offsets = [0, 0, 4], sizes = [16, 8, 4], strides = [1, 1, 1]} : vector<16x8x8xf32> to vector<16x8x4xf32>
    %7 = arith.maximumf %5, %6 : vector<16x8x4xf32>
    %c0_6 = arith.constant 0 : index
    %c0_7 = arith.constant 0 : index
    %c0_8 = arith.constant 0 : index
    %8 = vector.load %arg2[%c0_6, %c0_7, %c0_8] : memref<16x8x4xf32, #tpu.memory_space<vmem>>, vector<16x8x4xf32>
    tpu.vector_store %arg2[%c0_6, %c0_7, %c0_8], %7 {strides = array<i32>} : memref<16x8x4xf32, #tpu.memory_space<vmem>>, vector<16x8x4xf32>,
    return
  }
  func.func @transform_0(%arg0: i32) -> (i32, i32, i32, i32) {
    %c0_i32 = arith.constant 0 : i32
    %c0_i32_0 = arith.constant 0 : i32
    %c0_i32_1 = arith.constant 0 : i32
    %c0_i32_2 = arith.constant 0 : i32
    return %arg0, %c0_i32, %c0_i32_0, %c0_i32_1 : i32, i32, i32, i32
  }
  func.func @transform_1(%arg0: i32) -> (i32, i32, i32) {
    %c0_i32 = arith.constant 0 : i32
    %c0_i32_0 = arith.constant 0 : i32
    %c0_i32_1 = arith.constant 0 : i32
    return %arg0, %c0_i32, %c0_i32_0 : i32, i32, i32
  }
}

</mosaic_0001>

<bundles_post_ra>
// kernel: tpu_custom_call.1
= control target key start
LH: loop header
LB: loop body
LE: loop exit
PB: predicated region body
PF: predicated region fallthrough
CT: control target
= control target key end

     0   :  { %s175_s22 = smov 124   ;;  %vm137_vm0 = vcmask 31744   ;;  %s386_s0 = inlined_call_operand.vmem [shape: f32[16,2,8,8], index: 0, kind: input, shape index: {}]   ;;  %s387_s1 = inlined_call_operand.vmem [shape: f32[16,8,4], index: 1, kind: output, shape index: {}]  }
   0x1   :  { %v10_v0 = vld [vmem:[%s386_s0 + $0x20] sm:$0xff]  ;;  %v160_v1 = vld [vmem:[%s386_s0 + $0x28] sm:$0xff]  ;;  %v11_v5 = vld [vmem:[%s386_s0 + $0x30] sm:$0xff] }
   0x2   :  { %v8_v2 = vld [vmem:[%s386_s0] sm:$0xff]  ;;  %v195_v3 = vmax.f32 %v10_v0, %v160_v1  ;;  %v158_v4 = vld [vmem:[%s386_s0 + $0x8] sm:$0xff]  ;;  %v161_v6 = vld [vmem:[%s386_s0 + $0x38] sm:$0xff] }
   0x3   :  { %v206_v7 = vmax.f32 %v8_v2, %v158_v4  ;;  %v9_v8 = vld [vmem:[%s386_s0 + $0x10] sm:$0xff]  ;;  %v159_v9 = vld [vmem:[%s386_s0 + $0x18] sm:$0xff]  ;;  %v216_v10 = vmax.f32 %v11_v5, %v161_v6  ;;  %v12_v14 = vld [vmem:[%s386_s0 + $0x40] sm:$0xff] }
   0x4   :  { %77 = vrot.lane.b32.xlu1 %v195_v3, %s175_s22  ;;  %v220_v11 = vmax.f32 %v9_v8, %v159_v9  ;;  %v13_v12 = vld [vmem:[%s386_s0 + $0x50] sm:$0xff]  ;;  %v163_v13 = vld [vmem:[%s386_s0 + $0x58] sm:$0xff]  ;;  %v162_v15 = vld [vmem:[%s386_s0 + $0x48] sm:$0xff] }
   0x5   :  { %73 = vrot.lane.b32.xlu0 %v206_v7, %s175_s22  ;;  %v236_v16 = vmax.f32 %v13_v12, %v163_v13  ;;  %v240_v17 = vmax.f32 %v12_v14, %v162_v15  ;;  %v15_v18 = vld [vmem:[%s386_s0 + $0x70] sm:$0xff]  ;;  %v165_v19 = vld [vmem:[%s386_s0 + $0x78] sm:$0xff]  ;;  %v14_v20 = vld [vmem:[%s386_s0 + $0x60] sm:$0xff] }
   0x6   :  { %v164_v21 = vld [vmem:[%s386_s0 + $0x68] sm:$0xff]  ;;  %v48_v22 = vmax.f32 %v15_v18, %v165_v19  ;;  %v17_v24 = vld [vmem:[%s386_s0 + $0x90] sm:$0xff]  ;;  %v167_v25 = vld [vmem:[%s386_s0 + $0x98] sm:$0xff] }
   0x7   :  { %v47_v23 = vmax.f32 %v14_v20, %v164_v21  ;;  %v16_v26 = vld [vmem:[%s386_s0 + $0x80] sm:$0xff]  ;;  %v166_v27 = vld [vmem:[%s386_s0 + $0x88] sm:$0xff]  ;;  %v50_v28 = vmax.f32 %v17_v24, %v167_v25  ;;  %v19_v30 = vld [vmem:[%s386_s0 + $0xb0] sm:$0xff] }
   0x8   :  { %79 = vrot.lane.b32.xlu1 %v216_v10, %s175_s22  ;;  %v49_v29 = vmax.f32 %v16_v26, %v166_v27  ;;  %v169_v31 = vld [vmem:[%s386_s0 + $0xb8] sm:$0xff]  ;;  %v18_v32 = vld [vmem:[%s386_s0 + $0xa0] sm:$0xff]  ;;  %v168_v33 = vld [vmem:[%s386_s0 + $0xa8] sm:$0xff] }
   0x9   :  { %75 = vrot.lane.b32.xlu0 %v220_v11, %s175_s22  ;;  %v52_v34 = vmax.f32 %v19_v30, %v169_v31  ;;  %v51_v35 = vmax.f32 %v18_v32, %v168_v33  ;;  %v21_v36 = vld [vmem:[%s386_s0 + $0xd0] sm:$0xff]  ;;  %v171_v37 = vld [vmem:[%s386_s0 + $0xd8] sm:$0xff]  ;;  %v20_v38 = vld [vmem:[%s386_s0 + $0xc0] sm:$0xff] }
   0xa   :  { %v170_v39 = vld [vmem:[%s386_s0 + $0xc8] sm:$0xff]  ;;  %v54_v40 = vmax.f32 %v21_v36, %v171_v37  ;;  %v23_v42 = vld [vmem:[%s386_s0 + $0xf0] sm:$0xff]  ;;  %v173_v43 = vld [vmem:[%s386_s0 + $0xf8] sm:$0xff] }
   0xb   :  { %v53_v41 = vmax.f32 %v20_v38, %v170_v39  ;;  %v22_v44 = vld [vmem:[%s386_s0 + $0xe0] sm:$0xff]  ;;  %v172_v45 = vld [vmem:[%s386_s0 + $0xe8] sm:$0xff]  ;;  %v56_v46 = vmax.f32 %v23_v42, %v173_v43 }
   0xc   :  { %83 = vrot.lane.b32.xlu1 %v236_v16, %s175_s22  ;;  %v55_v47 = vmax.f32 %v22_v44, %v172_v45 }
   0xd   :  { %81 = vrot.lane.b32.xlu0 %v240_v17, %s175_s22 }
  0x10   :  { %87 = vrot.lane.b32.xlu1 %v48_v22, %s175_s22 }
  0x11   :  { %85 = vrot.lane.b32.xlu0 %v47_v23, %s175_s22 }
  0x14   :  { %91 = vrot.lane.b32.xlu1 %v50_v28, %s175_s22 }
  0x15   :  { %89 = vrot.lane.b32.xlu0 %v49_v29, %s175_s22 }
  0x18   :  { %95 = vrot.lane.b32.xlu1 %v52_v34, %s175_s22 }
  0x19   :  { %93 = vrot.lane.b32.xlu0 %v51_v35, %s175_s22 }
  0x1c   :  { %99 = vrot.lane.b32.xlu1 %v54_v40, %s175_s22 }
  0x1d   :  { %97 = vrot.lane.b32.xlu0 %v53_v41, %s175_s22 }
  0x20   :  { %103 = vrot.lane.b32.xlu1 %v56_v46, %s175_s22 }
  0x21   :  { %101 = vrot.lane.b32.xlu0 %v55_v47, %s175_s22 }
  0x76   :  { %v78_v48 = vpop.permute.xlu1 %77 }
  0x77   :  { %v123_v49 = vmax.f32 %v195_v3, %v78_v48  ;;  %v74_v50 = vpop.permute.xlu0 %73 }
  0x78   :  { %v121_v51 = vmax.f32 %v206_v7, %v74_v50 }
  0x79   :  { %140 = vst.msk [vmem:[%s387_s1 + $0x10] sm:$0xff] %vm137_vm0, %v123_v49 }
  0x7a   :  { %138 = vst.msk [vmem:[%s387_s1] sm:$0xff] %vm137_vm0, %v121_v51  ;;  %v80_v52 = vpop.permute.xlu1 %79 }
  0x7b   :  { %v124_v53 = vmax.f32 %v216_v10, %v80_v52  ;;  %v76_v54 = vpop.permute.xlu0 %75 }
  0x7c   :  { %v122_v55 = vmax.f32 %v220_v11, %v76_v54 }
  0x7d   :  { %141 = vst.msk [vmem:[%s387_s1 + $0x18] sm:$0xff] %vm137_vm0, %v124_v53 }
  0x7e   :  { %139 = vst.msk [vmem:[%s387_s1 + $0x8] sm:$0xff] %vm137_vm0, %v122_v55  ;;  %v84_v56 = vpop.permute.xlu1 %83 }
  0x7f   :  { %v126_v57 = vmax.f32 %v236_v16, %v84_v56  ;;  %v82_v58 = vpop.permute.xlu0 %81 }
  0x80   :  { %v125_v59 = vmax.f32 %v240_v17, %v82_v58 }
  0x81   :  { %143 = vst.msk [vmem:[%s387_s1 + $0x28] sm:$0xff] %vm137_vm0, %v126_v57 }
  0x82   :  { %142 = vst.msk [vmem:[%s387_s1 + $0x20] sm:$0xff] %vm137_vm0, %v125_v59  ;;  %v88_v60 = vpop.permute.xlu1 %87 }
  0x83   :  { %v128_v61 = vmax.f32 %v48_v22, %v88_v60  ;;  %v86_v62 = vpop.permute.xlu0 %85 }
  0x84   :  { %v127_v63 = vmax.f32 %v47_v23, %v86_v62 }
  0x85   :  { %145 = vst.msk [vmem:[%s387_s1 + $0x38] sm:$0xff] %vm137_vm0, %v128_v61 }
  0x86   :  { %144 = vst.msk [vmem:[%s387_s1 + $0x30] sm:$0xff] %vm137_vm0, %v127_v63  ;;  %v92_v0 = vpop.permute.xlu1 %91 }
  0x87   :  { %v130_v1 = vmax.f32 %v50_v28, %v92_v0  ;;  %v90_v2 = vpop.permute.xlu0 %89 }
  0x88   :  { %v129_v3 = vmax.f32 %v49_v29, %v90_v2 }
  0x89   :  { %147 = vst.msk [vmem:[%s387_s1 + $0x48] sm:$0xff] %vm137_vm0, %v130_v1 }
  0x8a   :  { %146 = vst.msk [vmem:[%s387_s1 + $0x40] sm:$0xff] %vm137_vm0, %v129_v3  ;;  %v96_v4 = vpop.permute.xlu1 %95 }
  0x8b   :  { %v132_v5 = vmax.f32 %v52_v34, %v96_v4  ;;  %v94_v6 = vpop.permute.xlu0 %93 }
  0x8c   :  { %v131_v7 = vmax.f32 %v51_v35, %v94_v6 }
  0x8d   :  { %149 = vst.msk [vmem:[%s387_s1 + $0x58] sm:$0xff] %vm137_vm0, %v132_v5 }
  0x8e   :  { %148 = vst.msk [vmem:[%s387_s1 + $0x50] sm:$0xff] %vm137_vm0, %v131_v7  ;;  %v100_v8 = vpop.permute.xlu1 %99 }
  0x8f   :  { %v134_v9 = vmax.f32 %v54_v40, %v100_v8  ;;  %v98_v10 = vpop.permute.xlu0 %97 }
  0x90   :  { %v133_v11 = vmax.f32 %v53_v41, %v98_v10 }
  0x91   :  { %151 = vst.msk [vmem:[%s387_s1 + $0x68] sm:$0xff] %vm137_vm0, %v134_v9 }
  0x92   :  { %150 = vst.msk [vmem:[%s387_s1 + $0x60] sm:$0xff] %vm137_vm0, %v133_v11  ;;  %v104_v12 = vpop.permute.xlu1 %103 }
  0x93   :  { %v136_v13 = vmax.f32 %v56_v46, %v104_v12  ;;  %v102_v14 = vpop.permute.xlu0 %101 }
  0x94   :  { %v135_v15 = vmax.f32 %v55_v47, %v102_v14 }
  0x95   :  { %153 = vst.msk [vmem:[%s387_s1 + $0x78] sm:$0xff] %vm137_vm0, %v136_v13 }
  0x96   :  { %152 = vst.msk [vmem:[%s387_s1 + $0x70] sm:$0xff] %vm137_vm0, %v135_v15 }

</bundles_post_ra>
